<compile_context>
chip_gen: v7x
topology: tpu7x:2x2x1
jax: 0.10.0
libtpu: 0.0.40
codegen_flags: <defaults>
</compile_context>

<pallas_src>
import math

import jax
import jax.numpy as jnp
from jax.experimental import pallas as pl
from jax.experimental.pallas import tpu as pltpu


def _largest_divisor_tile(n, max_tile, quantum):
    """Largest divisor of n that is <= max_tile and a multiple of `quantum`.
    Falls back to n itself (a full-extent block is always legal)."""
    if n <= max_tile:
        return n
    start = max_tile - (max_tile % quantum)
    for t in range(start, 0, -quantum):
        if n % t == 0:
            return t
    return n


def distribution_pooling_filter(data, *, num_bins=8, sigma=0.1,
                                max_tn=512, max_tf=1024):
    """Pallas TPU implementation of DistributionPoolingFilterBase.forward.

    data: (B, N, F) float32 (any float dtype is cast to f32, matching torch)
    returns: (B, F, num_bins) float32
    """
    data = jnp.asarray(data, jnp.float32)
    B, N, F = data.shape
    beta = -1.0 / (2.0 * sigma ** 2)
    scale = math.sqrt(-beta)          # 1 / (sqrt(2) * sigma)

    # torch.linspace(0, 1, steps=num_bins); steps == 1 gives [0.0].
    if num_bins == 1:
        pts = [0.0]
    else:
        pts = [i / (num_bins - 1) for i in range(num_bins)]
    scaled_pts = [float(p * scale) for p in pts]   # baked-in constants

    # N tile: multiple of 8 (sublane quantum) unless it is the full axis.
    tn = _largest_divisor_tile(N, max_tn, 8)
    # F tile: keep the full axis unless F is a large multiple of 128 lanes.
    if F > max_tf and F % 128 == 0:
        tf = _largest_divisor_tile(F, max_tf, 128)
    else:
        tf = F

    n_tiles = N // tn
    f_tiles = F // tf

    # Estimate VMEM for the double-buffered input tile + resident output tile;
    # raise the scoped VMEM limit only if we would exceed the default.
    in_bytes = 2 * tn * tf * 4
    out_bytes = 2 * num_bins * tf * 4
    need = in_bytes + out_bytes
    vmem_limit = None
    if need > (14 << 20):
        vmem_limit = min(int(need * 1.5) + (1 << 20), 100 << 20)

    def kernel(x_ref, o_ref):
        nt = pl.program_id(2)

        # (tn, tf) slab, F dense in lanes.  Pre-scale once so the per-bin
        # body is sub / square / exp / reduce; alfa is omitted (it cancels in
        # the normalization).
        x = x_ref[0] * scale
        rows = []
        for ck in scaled_pts:                         # unrolled over bins
            d = x - ck
            rows.append(jnp.sum(jnp.exp(-(d * d)), axis=0, keepdims=True))
        acc = jnp.concatenate(rows, axis=0)           # (num_bins, tf)

        # First reduction step writes directly (no zero-init pass), the rest
        # accumulate into the resident output block.
        @pl.when(nt == 0)
        def _():
            o_ref[0] = acc

        @pl.when(nt > 0)
        def _():
            o_ref[0] += acc

        # Finalize: normalize over the bins axis in place.
        @pl.when(nt == pl.num_programs(2) - 1)
        def _():
            a = o_ref[0]                                    # (num_bins, tf)
            norm = jnp.sum(a, axis=0, keepdims=True)        # (1, tf)
            o_ref[0] = a * pl.reciprocal(norm, approx=False)

    grid_spec = pltpu.PrefetchScalarGridSpec(
        num_scalar_prefetch=0,
        grid=(B, f_tiles, n_tiles),                   # reduction axis last
        in_specs=[
            pl.BlockSpec((1, tn, tf), lambda b, f, n: (b, n, f)),
        ],
        out_specs=pl.BlockSpec((1, num_bins, tf), lambda b, f, n: (b, 0, f)),
    )

    compiler_params = pltpu.CompilerParams(
        dimension_semantics=("parallel", "parallel", "arbitrary"),
        vmem_limit_bytes=vmem_limit,
    )

    out = pl.pallas_call(
        kernel,
        out_shape=jax.ShapeDtypeStruct((B, num_bins, F), jnp.float32),
        grid_spec=grid_spec,
        compiler_params=compiler_params,
    )(data)

    # Module returns (B, F, num_bins); transpose outside the kernel.
    return jnp.transpose(out, (0, 2, 1))


def distribution_pooling_filter_ref(data, *, num_bins=8, sigma=0.1):
    """Pure-JAX reference mirroring the PyTorch forward exactly."""
    alfa = 1.0 / math.sqrt(2.0 * math.pi * sigma ** 2)
    beta = -1.0 / (2.0 * sigma ** 2)
    sp = jnp.linspace(0.0, 1.0, num_bins, dtype=jnp.float32)
    diff = sp[None, None, None, :] - data[..., None]          # (B, N, F, K)
    result = alfa * jnp.exp(beta * diff ** 2)
    out_unnorm = jnp.sum(result, axis=1)                      # (B, F, K)
    norm = jnp.sum(out_unnorm, axis=2, keepdims=True)         # (B, F, 1)
    return out_unnorm / norm


if __name__ == "__main__":
    key = jax.random.PRNGKey(0)
    NUM_BINS, SIGMA = 8, 0.1

    # Small MIL-style input: (batch, num_instances, num_features) in [0, 1].
    B, N, F = 2, 16, 32
    data = jax.random.uniform(key, (B, N, F), dtype=jnp.float32)

    out = distribution_pooling_filter(data, num_bins=NUM_BINS, sigma=SIGMA)
    out = jax.block_until_ready(out)
    ref = distribution_pooling_filter_ref(data, num_bins=NUM_BINS, sigma=SIGMA)
    assert out.shape == (B, F, NUM_BINS)
    assert jnp.allclose(out, ref, atol=1e-5, rtol=1e-5), "mismatch vs reference"

    # Second check exercising the tiled N-reduction path (tn=512, 2 steps).
    key2 = jax.random.PRNGKey(1)
    B2, N2, F2 = 1, 1024, 256
    data2 = jax.random.uniform(key2, (B2, N2, F2), dtype=jnp.float32)
    out2 = jax.block_until_ready(
        distribution_pooling_filter(data2, num_bins=NUM_BINS, sigma=SIGMA))
    ref2 = distribution_pooling_filter_ref(data2, num_bins=NUM_BINS, sigma=SIGMA)
    assert out2.shape == (B2, F2, NUM_BINS)
    assert jnp.allclose(out2, ref2, atol=1e-4, rtol=1e-4), "mismatch (tiled N)"

    # Third check: module default num_bins=1 (degenerate linspace -> [0.0]).
    out3 = jax.block_until_ready(
        distribution_pooling_filter(data, num_bins=1, sigma=SIGMA))
    ref3 = distribution_pooling_filter_ref(data, num_bins=1, sigma=SIGMA)
    assert out3.shape == (B, F, 1)
    assert jnp.allclose(out3, ref3, atol=1e-5, rtol=1e-5), "mismatch (bins=1)"

    print("KERNEL_OK")
</pallas_src>

<mosaic_0001>
module attributes {stable_mosaic.version = 11 : i64} {
  func.func @kernel(%arg0: i32, %arg1: i32, %arg2: i32, %arg3: memref<1x16x32xf32, #tpu.memory_space<vmem>>, %arg4: memref<1x8x32xf32, #tpu.memory_space<vmem>>) attributes {dimension_semantics = [#tpu.dimension_semantics<parallel>, #tpu.dimension_semantics<parallel>, #tpu.dimension_semantics<arbitrary>], iteration_bounds = array<i64: 2, 1, 1>, scalar_prefetch = 0 : i64, scratch_operands = 0 : i64, tpu.core_type = #tpu.core_type<tc>, window_params = [{transform_indices = @transform_0, window_bounds = array<i64: 1, 16, 32>}, {transform_indices = @transform_1, window_bounds = array<i64: 1, 8, 32>}]} {
    %c0 = arith.constant 0 : index
    %c0_0 = arith.constant 0 : index
    %c0_1 = arith.constant 0 : index
    %0 = vector.load %arg3[%c0, %c0_0, %c0_1] : memref<1x16x32xf32, #tpu.memory_space<vmem>>, vector<1x16x32xf32>
    %1 = vector.shape_cast %0 : vector<1x16x32xf32> to vector<16x32xf32>
    %cst = arith.constant 7.07106781 : f32
    %2 = vector.broadcast %cst : f32 to vector<16x32xf32>
    %3 = arith.mulf %1, %2 : vector<16x32xf32>
    %cst_2 = arith.constant 0.000000e+00 : f32
    %4 = vector.broadcast %cst_2 : f32 to vector<16x32xf32>
    %5 = arith.subf %3, %4 : vector<16x32xf32>
    %6 = arith.mulf %5, %5 : vector<16x32xf32>
    %cst_3 = arith.constant 0.000000e+00 : f32
    %7 = vector.broadcast %cst_3 : f32 to vector<16x32xf32>
    %8 = arith.subf %7, %6 : vector<16x32xf32>
    %9 = math.exp %8 : vector<16x32xf32>
    %cst_4 = arith.constant dense<0.000000e+00> : vector<32xf32>
    %10 = vector.multi_reduction <add>, %9, %cst_4 [0] : vector<16x32xf32> to vector<32xf32>
    %11 = vector.shape_cast %10 : vector<32xf32> to vector<1x32xf32>
    %cst_5 = arith.constant 1.01015258 : f32
    %12 = vector.broadcast %cst_5 : f32 to vector<16x32xf32>
    %13 = arith.subf %3, %12 : vector<16x32xf32>
    %14 = arith.mulf %13, %13 : vector<16x32xf32>
    %cst_6 = arith.constant 0.000000e+00 : f32
    %15 = vector.broadcast %cst_6 : f32 to vector<16x32xf32>
    %16 = arith.subf %15, %14 : vector<16x32xf32>
    %17 = math.exp %16 : vector<16x32xf32>
    %cst_7 = arith.constant dense<0.000000e+00> : vector<32xf32>
    %18 = vector.multi_reduction <add>, %17, %cst_7 [0] : vector<16x32xf32> to vector<32xf32>
    %19 = vector.shape_cast %18 : vector<32xf32> to vector<1x32xf32>
    %cst_8 = arith.constant 2.02030516 : f32
    %20 = vector.broadcast %cst_8 : f32 to vector<16x32xf32>
    %21 = arith.subf %3, %20 : vector<16x32xf32>
    %22 = arith.mulf %21, %21 : vector<16x32xf32>
    %cst_9 = arith.constant 0.000000e+00 : f32
    %23 = vector.broadcast %cst_9 : f32 to vector<16x32xf32>
    %24 = arith.subf %23, %22 : vector<16x32xf32>
    %25 = math.exp %24 : vector<16x32xf32>
    %cst_10 = arith.constant dense<0.000000e+00> : vector<32xf32>
    %26 = vector.multi_reduction <add>, %25, %cst_10 [0] : vector<16x32xf32> to vector<32xf32>
    %27 = vector.shape_cast %26 : vector<32xf32> to vector<1x32xf32>
    %cst_11 = arith.constant 3.03045774 : f32
    %28 = vector.broadcast %cst_11 : f32 to vector<16x32xf32>
    %29 = arith.subf %3, %28 : vector<16x32xf32>
    %30 = arith.mulf %29, %29 : vector<16x32xf32>
    %cst_12 = arith.constant 0.000000e+00 : f32
    %31 = vector.broadcast %cst_12 : f32 to vector<16x32xf32>
    %32 = arith.subf %31, %30 : vector<16x32xf32>
    %33 = math.exp %32 : vector<16x32xf32>
    %cst_13 = arith.constant dense<0.000000e+00> : vector<32xf32>
    %34 = vector.multi_reduction <add>, %33, %cst_13 [0] : vector<16x32xf32> to vector<32xf32>
    %35 = vector.shape_cast %34 : vector<32xf32> to vector<1x32xf32>
    %cst_14 = arith.constant 4.04061031 : f32
    %36 = vector.broadcast %cst_14 : f32 to vector<16x32xf32>
    %37 = arith.subf %3, %36 : vector<16x32xf32>
    %38 = arith.mulf %37, %37 : vector<16x32xf32>
    %cst_15 = arith.constant 0.000000e+00 : f32
    %39 = vector.broadcast %cst_15 : f32 to vector<16x32xf32>
    %40 = arith.subf %39, %38 : vector<16x32xf32>
    %41 = math.exp %40 : vector<16x32xf32>
    %cst_16 = arith.constant dense<0.000000e+00> : vector<32xf32>
    %42 = vector.multi_reduction <add>, %41, %cst_16 [0] : vector<16x32xf32> to vector<32xf32>
    %43 = vector.shape_cast %42 : vector<32xf32> to vector<1x32xf32>
    %cst_17 = arith.constant 5.05076265 : f32
    %44 = vector.broadcast %cst_17 : f32 to vector<16x32xf32>
    %45 = arith.subf %3, %44 : vector<16x32xf32>
    %46 = arith.mulf %45, %45 : vector<16x32xf32>
    %cst_18 = arith.constant 0.000000e+00 : f32
    %47 = vector.broadcast %cst_18 : f32 to vector<16x32xf32>
    %48 = arith.subf %47, %46 : vector<16x32xf32>
    %49 = math.exp %48 : vector<16x32xf32>
    %cst_19 = arith.constant dense<0.000000e+00> : vector<32xf32>
    %50 = vector.multi_reduction <add>, %49, %cst_19 [0] : vector<16x32xf32> to vector<32xf32>
    %51 = vector.shape_cast %50 : vector<32xf32> to vector<1x32xf32>
    %cst_20 = arith.constant 6.06091547 : f32
    %52 = vector.broadcast %cst_20 : f32 to vector<16x32xf32>
    %53 = arith.subf %3, %52 : vector<16x32xf32>
    %54 = arith.mulf %53, %53 : vector<16x32xf32>
    %cst_21 = arith.constant 0.000000e+00 : f32
    %55 = vector.broadcast %cst_21 : f32 to vector<16x32xf32>
    %56 = arith.subf %55, %54 : vector<16x32xf32>
    %57 = math.exp %56 : vector<16x32xf32>
    %cst_22 = arith.constant dense<0.000000e+00> : vector<32xf32>
    %58 = vector.multi_reduction <add>, %57, %cst_22 [0] : vector<16x32xf32> to vector<32xf32>
    %59 = vector.shape_cast %58 : vector<32xf32> to vector<1x32xf32>
    %cst_23 = arith.constant 7.07106781 : f32
    %60 = vector.broadcast %cst_23 : f32 to vector<16x32xf32>
    %61 = arith.subf %3, %60 : vector<16x32xf32>
    %62 = arith.mulf %61, %61 : vector<16x32xf32>
    %cst_24 = arith.constant 0.000000e+00 : f32
    %63 = vector.broadcast %cst_24 : f32 to vector<16x32xf32>
    %64 = arith.subf %63, %62 : vector<16x32xf32>
    %65 = math.exp %64 : vector<16x32xf32>
    %cst_25 = arith.constant dense<0.000000e+00> : vector<32xf32>
    %66 = vector.multi_reduction <add>, %65, %cst_25 [0] : vector<16x32xf32> to vector<32xf32>
    %67 = vector.shape_cast %66 : vector<32xf32> to vector<1x32xf32>
    %68 = tpu.concatenate %11, %19, %27, %35, %43, %51, %59, %67 in 0 : vector<1x32xf32>, vector<1x32xf32>, vector<1x32xf32>, vector<1x32xf32>, vector<1x32xf32>, vector<1x32xf32>, vector<1x32xf32>, vector<1x32xf32> -> vector<8x32xf32>
    %c0_i32 = arith.constant 0 : i32
    %69 = arith.cmpi eq, %arg2, %c0_i32 : i32
    %70 = arith.extui %69 : i1 to i32
    %c0_i32_26 = arith.constant 0 : i32
    %71 = arith.cmpi ne, %70, %c0_i32_26 : i32
    scf.if %71 {
      %c0_31 = arith.constant 0 : index
      %c0_32 = arith.constant 0 : index
      %c0_33 = arith.constant 0 : index
      %78 = vector.load %arg4[%c0_31, %c0_32, %c0_33] : memref<1x8x32xf32, #tpu.memory_space<vmem>>, vector<1x8x32xf32>
      %79 = vector.shape_cast %78 : vector<1x8x32xf32> to vector<8x32xf32>
      %80 = vector.shape_cast %68 : vector<8x32xf32> to vector<1x8x32xf32>
      tpu.vector_store %arg4[%c0_31, %c0_32, %c0_33], %80 {strides = array<i32>} : memref<1x8x32xf32, #tpu.memory_space<vmem>>, vector<1x8x32xf32>,
    } else {
    }
    %c0_i32_27 = arith.constant 0 : i32
    %72 = arith.cmpi sgt, %arg2, %c0_i32_27 : i32
    %73 = arith.extui %72 : i1 to i32
    %c0_i32_28 = arith.constant 0 : i32
    %74 = arith.cmpi ne, %73, %c0_i32_28 : i32
    scf.if %74 {
      %c0_31 = arith.constant 0 : index
      %c0_32 = arith.constant 0 : index
      %c0_33 = arith.constant 0 : index
      %78 = vector.load %arg4[%c0_31, %c0_32, %c0_33] : memref<1x8x32xf32, #tpu.memory_space<vmem>>, vector<1x8x32xf32>
      %79 = vector.shape_cast %78 : vector<1x8x32xf32> to vector<8x32xf32>
      %80 = arith.addf %79, %68 : vector<8x32xf32>
      %c0_34 = arith.constant 0 : index
      %c0_35 = arith.constant 0 : index
      %c0_36 = arith.constant 0 : index
      %81 = vector.load %arg4[%c0_34, %c0_35, %c0_36] : memref<1x8x32xf32, #tpu.memory_space<vmem>>, vector<1x8x32xf32>
      %82 = vector.shape_cast %81 : vector<1x8x32xf32> to vector<8x32xf32>
      %83 = vector.shape_cast %80 : vector<8x32xf32> to vector<1x8x32xf32>
      tpu.vector_store %arg4[%c0_34, %c0_35, %c0_36], %83 {strides = array<i32>} : memref<1x8x32xf32, #tpu.memory_space<vmem>>, vector<1x8x32xf32>,
    } else {
    }
    %c0_i32_29 = arith.constant 0 : i32
    %75 = arith.cmpi eq, %arg2, %c0_i32_29 : i32
    %76 = arith.extui %75 : i1 to i32
    %c0_i32_30 = arith.constant 0 : i32
    %77 = arith.cmpi ne, %76, %c0_i32_30 : i32
    scf.if %77 {
      %c0_31 = arith.constant 0 : index
      %c0_32 = arith.constant 0 : index
      %c0_33 = arith.constant 0 : index
      %78 = vector.load %arg4[%c0_31, %c0_32, %c0_33] : memref<1x8x32xf32, #tpu.memory_space<vmem>>, vector<1x8x32xf32>
      %79 = vector.shape_cast %78 : vector<1x8x32xf32> to vector<8x32xf32>
      %cst_34 = arith.constant dense<0.000000e+00> : vector<32xf32>
      %80 = vector.multi_reduction <add>, %79, %cst_34 [0] : vector<8x32xf32> to vector<32xf32>
      %81 = vector.shape_cast %80 : vector<32xf32> to vector<1x32xf32>
      %82 = tpu.reciprocal %81 : vector<1x32xf32> -> vector<1x32xf32>
      %83 = vector.broadcast %82 : vector<1x32xf32> to vector<8x32xf32>
      %84 = arith.mulf %79, %83 : vector<8x32xf32>
      %c0_35 = arith.constant 0 : index
      %c0_36 = arith.constant 0 : index
      %c0_37 = arith.constant 0 : index
      %85 = vector.load %arg4[%c0_35, %c0_36, %c0_37] : memref<1x8x32xf32, #tpu.memory_space<vmem>>, vector<1x8x32xf32>
      %86 = vector.shape_cast %85 : vector<1x8x32xf32> to vector<8x32xf32>
      %87 = vector.shape_cast %84 : vector<8x32xf32> to vector<1x8x32xf32>
      tpu.vector_store %arg4[%c0_35, %c0_36, %c0_37], %87 {strides = array<i32>} : memref<1x8x32xf32, #tpu.memory_space<vmem>>, vector<1x8x32xf32>,
    } else {
    }
    return
  }
  func.func @transform_0(%arg0: i32, %arg1: i32, %arg2: i32) -> (i32, i32, i32) {
    %c0_i32 = arith.constant 0 : i32
    return %arg0, %arg2, %arg1 : i32, i32, i32
  }
  func.func @transform_1(%arg0: i32, %arg1: i32, %arg2: i32) -> (i32, i32, i32) {
    %c0_i32 = arith.constant 0 : i32
    %c0_i32_0 = arith.constant 0 : i32
    return %arg0, %c0_i32, %arg1 : i32, i32, i32
  }
}

</mosaic_0001>

<bundles_post_ra>
// kernel: tpu_custom_call.1
= control target key start
LH: loop header
LB: loop body
LE: loop exit
PB: predicated region body
PF: predicated region fallthrough
CT: control target
= control target key end

     0   :  { %6 = vsyncpa [#allocation3], 0  ;;  %s920_s0 = inlined_call_operand.hbm [shape: f32[2,16,32], index: 0, kind: input, shape index: {}]   ;;  %s921_s1 = inlined_call_operand.hbm [shape: f32[2,8,32], index: 1, kind: output, shape index: {}]  }
   0x1   :  { %8 = vsyncpa [#allocation3 + $0x1], 0 }
   0x2   :  { %9 = vsyncpa [#allocation4], 0 }
   0x3   :  { %11 = vsyncpa [#allocation4 + $0x1], 0  ;;  %s715_s6 = smov 0   ;;  %s717_s7 = smov 0  }
   0x4   :  { %s719_s8 = smov 0   ;;  %s721_s9 = smov 0  }
   0x5   :  { %s723_s10 = smov 0   ;;  %s725_s11 = smov 0  }
   0x6 LB: > { %s460_s12 = sadd.s32 4294967295, %s699_s11   ;;  %s461_s13 = sadd.s32 4294967294, %s699_s11   ;;  %s699_s11 = sphi %s725_s11, %s17_s11   ;;  %s695_s10 = sphi %s723_s10, %s936_s10   ;;  %s691_s9 = sphi %s721_s9, %s935_s9   ;;  %s687_s8 = sphi %s719_s8, %s934_s8   ;;  %s683_s7 = sphi %s717_s7, %s933_s7   ;;  %s679_s6 = sphi %s715_s6, %s932_s6  }
   0x7   : > { %s36_s14 = sadd.s32 1, %s695_s10  ;;  %s47_s15 = sadd.s32 1, %s687_s8 }
   0x8   : > { %p38_p0 = scmp.ge.s32.totalorder %s36_s14, 2  ;;  %p54_p1 = scmp.ne.s32.totalorder %s687_s8, %s683_s7 }
   0x9   : > { %p55_p2 = scmp.eq.s32.totalorder %s699_s11, 0  ;;  %p60_p3 = scmp.ne.s32.totalorder %s683_s7, %s679_s6 }
   0xa   : > { %s938_s14 = smov (%p38_p0, %s36_s14), 0  ;;  %p61_p5 = scmp.eq.s32.totalorder %s460_s12, 0 }
   0xb   : > { %p756_p4 = por %p55_p2, %p54_p1  ;;  %s40_s17 = ssub.s32 %s695_s10, %s938_s14 }
   0xc   : > { %p86_p6 = scmp.eq.s32.totalorder %s460_s12, 1  ;;  %p45_p7 = scmp.eq.s32.totalorder %s40_s17, 0 }
   0xd   : > { %p762_p8 = por %p61_p5, %p60_p3  ;;  %p92_p10 = scmp.eq.s32.totalorder %s461_s13, 1 }
   0xe   : > { %p766_p9 = por %p86_p6, %p54_p1  ;;  %p501_p13 = scmp.lt.s32.totalorder %s699_s11, 2 }
   0xf   : > { %s771_s20 = scalar_select %p45_p7, %s687_s8, %s47_s15  }
  0x10   : > { %s925_s19 = scalar_select %p766_p9, 1, 0 }
  0x11   : > { %p773_p11 = por %p92_p10, %p60_p3  ;;  %s112_s22 = sand.u32 1, %s687_s8  }
  0x12   : > { %s464_s23 = sshll.u32 %s112_s22, 4  ;;  %s488_s24 = sshll.u32 %s695_s10, 8 }
  0x13   : > { %s926_s21 = scalar_select %p773_p11, 1, 0 }
  0x14   : > { %s784_s27 = scalar_lea.hbm %s920_s0, %s488_s24  ;;  %s116_s28 = scalar_lea.vmem [#allocation2], %s464_s23 }
  0x15   : > { %s126_s29 = sshll.u32 %s116_s28, 4  ;;  %p790_p0 = pnand %p501_p13, %p756_p4  ;;  %s786_s29 = int_to_ptr.vmem [resolvable:$true] %s126_s29 }
  0x16   : > { %s795_s2 = scalar_lea.sflag [#allocation3], %s112_s22  ;;  %s587_s3 = scalar_lea.hbm %s784_s27, 256 }
  0x17   : > { %p588_p2 = scmp.ne.s32.totalorder %s784_s27, %s587_s3  ;;  %p589_p3 = pneg %p790_p0 }
  0x18   : > { %s592_s12 = scalar_lea.hbm %s920_s0, 512  ;;  %p593_p4 = scmp.lt.u32.totalorder %s784_s27, %s920_s0 }
  0x19   : > { %p590_p5 = pnand %p589_p3, %p588_p2  ;;  %p594_p7 = scmp.lt.u32.totalorder %s592_s12, %s587_s3 }
  0x1a   : > { %p596_p13 = scmp.lt.u32.totalorder %s587_s3, %s784_s27 }
  0x1b   : > { %p591_p6 = pneg %p590_p5  ;;  %p595_p10 = por %p594_p7, %p593_p4 }
  0x1d   : > { %p597_p12 = por %p596_p13, %p595_p10 }
  0x1f   : > { %p598_p1 = pnand %p597_p12, %p591_p6 }
  0x21   : > { %601 = shalt.err (!%p598_p1)
}
  0x22   : > { %s602_s16 = scalar_lea.vmem %s786_s29, 256  ;;  %s701_s17 = smov [#allocation2]  }
  0x23   : > { %p603_p2 = scmp.ne.s32.totalorder %s786_s29, %s602_s16  ;;  %s607_s22 = sshll.u32 %s701_s17, 4  ;;  %s608_s22 = int_to_ptr.vmem [resolvable:$false] %s607_s22 }
  0x24   : > { %s609_s23 = scalar_lea.vmem %s608_s22, 512  ;;  %p610_p9 = scmp.lt.s32.totalorder %s786_s29, %s608_s22 }
  0x25   : > { %p605_p5 = pnand %p603_p2, %p589_p3  ;;  %p611_p4 = scmp.lt.s32.totalorder %s609_s23, %s602_s16 }
  0x27   : > { %p606_p11 = pneg %p605_p5  ;;  %p612_p7 = por %p611_p4, %p610_p9 }
  0x29   : > { %p613_p10 = pnand %p612_p7, %p606_p11 }
  0x2b   : > { %616 = shalt.err (!%p613_p10)
}
  0x2c   : > { %s702_s24 = smov 128   ;;  %s703_s25 = smov 8  }
  0x2d   : > { %496 = dma.hbm_to_vmem [thread:$0]  (!%p790_p0), %s784_s27, 256, %s786_s29, %s795_s2, %s702_s24, %s702_s24, %s703_s25  }
  0x2e   : > { %p134_p12 = scmp.lt.s32.totalorder %s699_s11, 3  ;;  %p928_p1 = scmp.ge.s32.totalorder %s699_s11, 1 }
  0x30   : > { %p135_p3 = pnand %p928_p1, %p134_p12 }
  0x31   : > { %s827_s26 = sand.u32 (!%p135_p3), 1, %s683_s7  }
  0x32   : > { %138 = sbr.rel (%p135_p3) target bundleno = 160 (0xa0), region = 24  ;;  %s468_s28 = sshll.u32 (!%p135_p3), %s827_s26, 4 }
  0x33   : > { %s141_s3 = scalar_lea.sflag (!%p135_p3), [#allocation3], %s827_s26  ;;  %s144_s4 = scalar_lea.vmem (!%p135_p3), [#allocation2], %s468_s28 }
  0x39   : > { %670 = dma.done.wait (%p762_p8), %s141_s3, 256  }
  0x3a   : > { %672 = vsyncadd (%p762_p8), %s141_s3, 4294967040  ;;  %v164_v0 = vld [vmem:[%s144_s4] sm:$0xff]  ;;  %v165_v1 = vld [vmem:[%s144_s4 + $0x8] sm:$0xff]  ;;  %vm176_vm0 = vcmask 261120   ;;  %vm319_vm1 = vcmask 1040384   ;;  %vm321_vm2 = vcmask 1041408  }
  0x3b   : > { %v166_v2 = vmul.f32 7.071068, %v164_v0  ;;  %v835_v3 = vmul.f32 7.071068, %v165_v1  ;;  %vm323_vm3 = vcmask 1042432   ;;  %vm325_vm4 = vcmask 1043456  }
  0x3c   : > { %vm327_vm5 = vcmask 1044480   ;;  %vm329_vm6 = vcmask 1045504   ;;  %s469_s18 = sshll.u32 %s827_s26, 3  ;;  %vm331_vm7 = vcmask 1046528   ;;  %s485_s29 = sshll.u32 %s691_s9, 7 }
  0x3d   : > { %v168_v4 = vmul.f32 %v166_v2, %v166_v2  ;;  %v169_v5 = vmul.f32 %v835_v3, %v835_v3  ;;  %v470_v6 = vadd.f32 -1.0101526, %v166_v2  ;;  %v471_v7 = vadd.f32 -1.0101526, %v835_v3  ;;  %s162_s27 = scalar_lea.vmem [#allocation5], %s469_s18  ;;  %s870_s12 = scalar_lea.hbm %s921_s1, %s485_s29 }
  0x3e   : > { %v472_v8 = vadd.f32 -2.0203052, %v166_v2  ;;  %v473_v9 = vadd.f32 -2.0203052, %v835_v3  ;;  %v474_v10 = vadd.f32 -3.0304577, %v166_v2 }
  0x3f   : > { %v170_v11 = vsub.f32 0.0, %v168_v4  ;;  %v171_v12 = vsub.f32 0.0, %v169_v5  ;;  %v188_v13 = vmul.f32 %v470_v6, %v470_v6  ;;  %v189_v14 = vmul.f32 %v471_v7, %v471_v7  ;;  %s374_s30 = sshll.u32 %s162_s27, 4  ;;  %s360_s13 = scalar_lea.sflag [#allocation4], %s827_s26  ;;  %s872_s30 = int_to_ptr.vmem [resolvable:$true] %s374_s30 }
  0x40   : > { %v207_v15 = vmul.f32 %v472_v8, %v472_v8  ;;  %v208_v16 = vmul.f32 %v473_v9, %v473_v9  ;;  %v475_v17 = vadd.f32 -3.0304577, %v835_v3  ;;  %v226_v18 = vmul.f32 %v474_v10, %v474_v10  ;;  %s617_s15 = scalar_lea.vmem %s872_s30, 128  ;;  %p929_p9 = scmp.ne.s32.totalorder %s925_s19, 0 }
  0x41   : > { %v172_v19 = vmul.f32 1.442695, %v170_v11  ;;  %v174_v20 = vmul.f32 1.442695, %v171_v12  ;;  %v190_v21 = vsub.f32 0.0, %v188_v13  ;;  %v191_v22 = vsub.f32 0.0, %v189_v14  ;;  %p618_p8 = scmp.ne.s32.totalorder %s872_s30, %s617_s15 }
  0x42   : > { %v209_v23 = vsub.f32 0.0, %v207_v15  ;;  %v210_v24 = vsub.f32 0.0, %v208_v16  ;;  %v227_v25 = vmul.f32 %v475_v17, %v475_v17  ;;  %v228_v26 = vsub.f32 0.0, %v226_v18  ;;  %s704_s9 = smov [#allocation5]  }
  0x43   : > { %553 = vpow2.f32 %v172_v19  ;;  %v192_v27 = vmul.f32 1.442695, %v190_v21  ;;  %v194_v28 = vmul.f32 1.442695, %v191_v22  ;;  %v476_v29 = vadd.f32 -4.0406103, %v166_v2  ;;  %p619_p11 = pnand %p618_p8, %p929_p9 }
  0x44   : > { %555 = vpow2.f32 %v174_v20  ;;  %v211_v30 = vmul.f32 1.442695, %v209_v23  ;;  %v213_v31 = vmul.f32 1.442695, %v210_v24  ;;  %v229_v32 = vsub.f32 0.0, %v227_v25  ;;  %s621_s16 = sshll.u32 %s704_s9, 4  ;;  %s622_s16 = int_to_ptr.vmem [resolvable:$false] %s621_s16 }
  0x45   : > { %557 = vpow2.f32 %v192_v27  ;;  %v230_v33 = vmul.f32 1.442695, %v228_v26  ;;  %v477_v34 = vadd.f32 -4.0406103, %v835_v3  ;;  %v245_v35 = vmul.f32 %v476_v29, %v476_v29  ;;  %p620_p0 = pneg %p619_p11  ;;  %s623_s17 = scalar_lea.vmem %s622_s16, 256 }
  0x46   : > { %559 = vpow2.f32 %v194_v28  ;;  %v232_v36 = vmul.f32 1.442695, %v229_v32  ;;  %v478_v37 = vadd.f32 -5.0507627, %v166_v2  ;;  %v479_v38 = vadd.f32 -5.0507627, %v835_v3  ;;  %p624_p6 = scmp.lt.s32.totalorder %s872_s30, %s622_s16  ;;  %p625_p13 = scmp.lt.s32.totalorder %s623_s17, %s617_s15 }
  0x47   : > { %561 = vpow2.f32 %v211_v30  ;;  %v246_v39 = vmul.f32 %v477_v34, %v477_v34  ;;  %v247_v40 = vsub.f32 0.0, %v245_v35  ;;  %v480_v41 = vadd.f32 -6.0609155, %v166_v2 }
  0x48   : > { %563 = vpow2.f32 %v213_v31  ;;  %v264_v42 = vmul.f32 %v478_v37, %v478_v37  ;;  %v265_v43 = vmul.f32 %v479_v38, %v479_v38  ;;  %v481_v44 = vadd.f32 -6.0609155, %v835_v3  ;;  %p626_p2 = por %p625_p13, %p624_p6 }
  0x49   : > { %565 = vpow2.f32 %v230_v33  ;;  %v248_v45 = vsub.f32 0.0, %v246_v39  ;;  %v249_v46 = vmul.f32 1.442695, %v247_v40  ;;  %v283_v47 = vmul.f32 %v480_v41, %v480_v41 }
  0x4a   : > { %567 = vpow2.f32 %v232_v36  ;;  %v266_v48 = vsub.f32 0.0, %v264_v42  ;;  %v267_v49 = vsub.f32 0.0, %v265_v43  ;;  %v284_v50 = vmul.f32 %v481_v44, %v481_v44  ;;  %p627_p5 = pnand %p626_p2, %p620_p0 }
  0x4b   : > { %569 = vpow2.f32 %v249_v46  ;;  %v251_v51 = vmul.f32 1.442695, %v248_v45  ;;  %v285_v52 = vsub.f32 0.0, %v283_v47  ;;  %v482_v53 = vadd.f32 -7.071068, %v166_v2 }
  0x4c   : > { %v268_v54 = vmul.f32 1.442695, %v266_v48  ;;  %v270_v55 = vmul.f32 1.442695, %v267_v49  ;;  %v286_v56 = vsub.f32 0.0, %v284_v50 }
  0x4d   : > { %v554_v57 = vpop.eup %553  ;;  %571 = vpow2.f32 %v251_v51  ;;  %v287_v58 = vmul.f32 1.442695, %v285_v52  ;;  %v483_v59 = vadd.f32 -7.071068, %v835_v3  ;;  %v302_v60 = vmul.f32 %v482_v53, %v482_v53 }
  0x4e   : > { %v556_v61 = vpop.eup %555  ;;  %v177_v62 = vsel %vm176_vm0, %v554_v57, 0.0  ;;  %573 = vpow2.f32 %v268_v54  ;;  %v289_v63 = vmul.f32 1.442695, %v286_v56 }
  0x4f   : > { %v558_v0 = vpop.eup %557  ;;  %v178_v1 = vsel %vm176_vm0, %v556_v61, 0.0  ;;  %575 = vpow2.f32 %v270_v55  ;;  %v303_v4 = vmul.f32 %v483_v59, %v483_v59  ;;  %v304_v2 = vsub.f32 0.0, %v302_v60 }
  0x50   : > { %v560_v5 = vpop.eup %559  ;;  %v179_v6 = vadd.f32 %v178_v1, %v177_v62  ;;  %v196_v7 = vsel %vm176_vm0, %v558_v0, 0.0  ;;  %577 = vpow2.f32 %v287_v58 }
  0x51   : > { %v562_v8 = vpop.eup %561  ;;  %v197_v3 = vsel %vm176_vm0, %v560_v5, 0.0  ;;  %579 = vpow2.f32 %v289_v63  ;;  %v305_v9 = vsub.f32 0.0, %v303_v4  ;;  %v306_v10 = vmul.f32 1.442695, %v304_v2 }
  0x52   : > { %v564_v11 = vpop.eup %563  ;;  %v180_v12 = vrot.slane %v179_v6, 4  ;;  %v198_v13 = vadd.f32 %v197_v3, %v196_v7  ;;  %v215_v14 = vsel %vm176_vm0, %v562_v8, 0.0 }
  0x53   : > { %v566_v15 = vpop.eup %565  ;;  %v216_v16 = vsel %vm176_vm0, %v564_v11, 0.0  ;;  %581 = vpow2.f32 %v306_v10  ;;  %v308_v17 = vmul.f32 1.442695, %v305_v9 }
  0x54   : > { %v568_v18 = vpop.eup %567  ;;  %v181_v19 = vadd.f32 %v180_v12, %v179_v6  ;;  %v199_v20 = vrot.slane %v198_v13, 4  ;;  %v217_v21 = vadd.f32 %v216_v16, %v215_v14  ;;  %v234_v22 = vsel %vm176_vm0, %v566_v15, 0.0 }
  0x55   : > { %v570_v23 = vpop.eup %569  ;;  %v235_v24 = vsel %vm176_vm0, %v568_v18, 0.0  ;;  %583 = vpow2.f32 %v308_v17 }
  0x56   : > { %v182_v25 = vrot.slane %v181_v19, 2  ;;  %v200_v26 = vadd.f32 %v199_v20, %v198_v13  ;;  %v218_v27 = vrot.slane %v217_v21, 4  ;;  %v236_v28 = vadd.f32 %v235_v24, %v234_v22 }
  0x57   : > { %v572_v29 = vpop.eup %571  ;;  %v253_v30 = vsel %vm176_vm0, %v570_v23, 0.0 }
  0x58   : > { %v574_v31 = vpop.eup %573  ;;  %v183_v32 = vadd.f32 %v182_v25, %v181_v19  ;;  %v201_v33 = vrot.slane %v200_v26, 2  ;;  %v219_v34 = vadd.f32 %v218_v27, %v217_v21  ;;  %v237_v35 = vrot.slane %v236_v28, 4 }
  0x59   : > { %v576_v36 = vpop.eup %575  ;;  %v254_v37 = vsel %vm176_vm0, %v572_v29, 0.0  ;;  %v272_v38 = vsel %vm176_vm0, %v574_v31, 0.0 }
  0x5a   : > { %v578_v39 = vpop.eup %577  ;;  %v184_v40 = vrot.slane %v183_v32, 1  ;;  %v202_v41 = vadd.f32 %v201_v33, %v200_v26  ;;  %v220_v42 = vrot.slane %v219_v34, 2  ;;  %v238_v43 = vadd.f32 %v237_v35, %v236_v28 }
  0x5b   : > { %v580_v44 = vpop.eup %579  ;;  %v255_v45 = vadd.f32 %v254_v37, %v253_v30  ;;  %v273_v46 = vsel %vm176_vm0, %v576_v36, 0.0  ;;  %v291_v47 = vsel %vm176_vm0, %v578_v39, 0.0 }
  0x5c   : > { %v203_v48 = vrot.slane %v202_v41, 1  ;;  %v221_v49 = vadd.f32 %v220_v42, %v219_v34  ;;  %v239_v50 = vrot.slane %v238_v43, 2  ;;  %v185_v52 = vadd.f32 %v184_v40, %v183_v32 }
  0x5d   : > { %v582_v51 = vpop.eup %581  ;;  %v256_v53 = vrot.slane %v255_v45, 4  ;;  %v274_v54 = vadd.f32 %v273_v46, %v272_v38  ;;  %v292_v55 = vsel %vm176_vm0, %v580_v44, 0.0 }
  0x5e   : > { %v204_v56 = vadd.f32 %v203_v48, %v202_v41  ;;  %v222_v57 = vrot.slane %v221_v49, 1  ;;  %v240_v58 = vadd.f32 %v239_v50, %v238_v43  ;;  %v293_v59 = vadd.f32 %v292_v55, %v291_v47 }
  0x5f   : > { %v584_v60 = vpop.eup %583  ;;  %v257_v61 = vadd.f32 %v256_v53, %v255_v45  ;;  %v275_v62 = vrot.slane %v274_v54, 4  ;;  %v310_v63 = vsel %vm176_vm0, %v582_v51, 0.0 }
  0x60   : > { %v223_v0 = vadd.f32 %v222_v57, %v221_v49  ;;  %v241_v1 = vrot.slane %v240_v58, 1  ;;  %v294_v4 = vrot.slane %v293_v59, 4  ;;  %v311_v2 = vsel %vm176_vm0, %v584_v60, 0.0 }
  0x61   : > { %v258_v5 = vrot.slane %v257_v61, 2  ;;  %v276_v6 = vadd.f32 %v275_v62, %v274_v54  ;;  %v312_v7 = vadd.f32 %v311_v2, %v310_v63  ;;  %v320_v8 = vsel %vm319_vm1, %v185_v52, %v204_v56 }
  0x62   : > { %v242_v3 = vadd.f32 %v241_v1, %v240_v58  ;;  %v295_v9 = vadd.f32 %v294_v4, %v293_v59  ;;  %v322_v13 = vsel %vm321_vm2, %v320_v8, %v223_v0 }
  0x63   : > { %v259_v10 = vadd.f32 %v258_v5, %v257_v61  ;;  %v277_v11 = vrot.slane %v276_v6, 2  ;;  %v313_v12 = vrot.slane %v312_v7, 4 }
  0x64   : > { %v296_v14 = vrot.slane %v295_v9, 2  ;;  %v324_v19 = vsel %vm323_vm3, %v322_v13, %v242_v3 }
  0x65   : > { %v260_v15 = vrot.slane %v259_v10, 1  ;;  %v278_v16 = vadd.f32 %v277_v11, %v276_v6  ;;  %v314_v17 = vadd.f32 %v313_v12, %v312_v7 }
  0x66   : > { %v297_v18 = vadd.f32 %v296_v14, %v295_v9 }
  0x67   : > { %v261_v20 = vadd.f32 %v260_v15, %v259_v10  ;;  %v279_v21 = vrot.slane %v278_v16, 1  ;;  %v315_v22 = vrot.slane %v314_v17, 2 }
  0x68   : > { %v298_v23 = vrot.slane %v297_v18, 1 }
  0x69   : > { %v280_v24 = vadd.f32 %v279_v21, %v278_v16  ;;  %v316_v25 = vadd.f32 %v315_v22, %v314_v17  ;;  %v326_v26 = vsel %vm325_vm4, %v324_v19, %v261_v20 }
  0x6a   : > { %v299_v27 = vadd.f32 %v298_v23, %v297_v18 }
  0x6b   : > { %v317_v28 = vrot.slane %v316_v25, 1  ;;  %v328_v29 = vsel %vm327_vm5, %v326_v26, %v280_v24 }
  0x6c   : > { %v330_v30 = vsel %vm329_vm6, %v328_v29, %v299_v27 }
  0x6d   : > { %v318_v31 = vadd.f32 %v317_v28, %v316_v25 }
  0x6f   : > { %v332_v32 = vsel %vm331_vm7, %v330_v30, %v318_v31 }
  0x70   : > { %337 = vst.msk [vmem:[%s162_s27] sm:$0xff] %vm176_vm0, %v332_v32 }
  0x77   : > { %v348_v33 = vld [vmem:[%s162_s27] sm:$0xff] }
  0x78   : > { %v349_v34 = vsel %vm176_vm0, %v348_v33, 0.0 }
  0x79   : > { %v350_v35 = vrot.slane %v349_v34, 4 }
  0x7b   : > { %v351_v36 = vadd.f32 %v350_v35, %v349_v34 }
  0x7d   : > { %v352_v37 = vrot.slane %v351_v36, 2 }
  0x7f   : > { %v353_v38 = vadd.f32 %v352_v37, %v351_v36 }
  0x81   : > { %v354_v39 = vrot.slane %v353_v38, 1 }
  0x83   : > { %v355_v40 = vadd.f32 %v354_v39, %v353_v38 }
  0x85   : > { %585 = vrcp.f32 %v355_v40 }
  0x8f   : > { %v586_v41 = vpop.eup %585 }
  0x90   : > { %v357_v42 = vmul.f32 %v586_v41, %v348_v33 }
  0x92   : > { %358 = vst.msk [vmem:[%s162_s27] sm:$0xff] %vm176_vm0, %v357_v42 }
  0x93   : > { %630 = shalt.err (!%p627_p5)
}
  0x94   : > { %s631_s22 = scalar_lea.hbm %s870_s12, 128  ;;  %s635_s25 = scalar_lea.hbm %s921_s1, 256 }
  0x95   : > { %p632_p4 = scmp.ne.s32.totalorder %s870_s12, %s631_s22  ;;  %p636_p12 = scmp.lt.u32.totalorder %s870_s12, %s921_s1 }
  0x96   : > { %p637_p1 = scmp.lt.u32.totalorder %s635_s25, %s631_s22  ;;  %p639_p8 = scmp.lt.u32.totalorder %s631_s22, %s870_s12 }
  0x97   : > { %p633_p7 = pnand %p632_p4, %p929_p9 }
  0x98   : > { %p638_p3 = por %p637_p1, %p636_p12 }
  0x99   : > { %p634_p10 = pneg %p633_p7 }
  0x9a   : > { %p640_p11 = por %p639_p8, %p638_p3 }
  0x9c   : > { %p641_p0 = pnand %p640_p11, %p634_p10 }
  0x9e   : > { %644 = shalt.err (!%p641_p0)
}
  0x9f   : > { %491 = dma.vmem_to_hbm [thread:$0]  (%p929_p9), %s872_s30, 128, %s870_s12, %s360_s13  }
  0xa0 PF: > { %s386_s3 = sand.u32 1, %s679_s6   ;;  %p930_p6 = scmp.ne.s32.totalorder %s926_s21, 0 }
  0xa1   : > { %p931_p13 = scmp.ge.s32.totalorder %s699_s11, 2  ;;  %s387_s4 = scalar_lea.sflag [#allocation4], %s386_s3 }
  0xa3   : > { %p498_p2 = pnand %p931_p13, %p930_p6 }
  0xa5   : > { %674 = dma.done.wait (!%p498_p2), %s387_s4, 128  }
  0xa6   : > { %676 = vsyncadd (!%p498_p2), %s387_s4, 4294967168  ;;  %s17_s11 = sadd.s32 1, %s699_s11   ;;  %s932_s6 = smov %s683_s7 }
  0xa7   : > { %p14_p5 = scmp.ge.s32.totalorder %s17_s11, 4   ;;  %s933_s7 = smov %s687_s8 }
  0xa8   : > { %s934_s8 = smov %s771_s20  ;;  %s935_s9 = smov %s695_s10 }
  0xa9   : > { %s936_s10 = smov %s938_s14  ;;  %16 = sbr.rel (!%p14_p5) target bundleno = 6 (0x6), region = 81 }
  0xb0   :  { %392 = vsyncpa [#allocation3], 1 }
  0xb1   :  { %394 = vsyncpa [#allocation3 + $0x1], 1 }
  0xb2   :  { %395 = vsyncpa [#allocation4], 1 }
  0xb3   :  { %397 = vsyncpa [#allocation4 + $0x1], 1 }

</bundles_post_ra>
